<compile_context>
chip_gen: v7x
topology: tpu7x:2x2x1
jax: 0.10.0
libtpu: 0.0.40
codegen_flags: <defaults>
</compile_context>

<pallas_src>
import jax
import jax.numpy as jnp
from jax.experimental import pallas as pl
from jax.experimental.pallas import tpu as pltpu


# --------------------------------------------------------------------------
# helpers
# --------------------------------------------------------------------------
def _round_up(v, m):
    return ((v + m - 1) // m) * m


def _padded_bytes(rows, cols, itemsize):
    # Physical VMEM footprint of a (rows, cols) block: (8, 128) tile padding.
    return _round_up(max(rows, 1), 8) * _round_up(max(cols, 1), 128) * itemsize


def _vmem_capacity_bytes():
    try:
        info = pltpu.get_tpu_info()
        cap = getattr(info, "vmem_capacity_bytes", None)
        if cap:
            return int(cap)
    except Exception:
        pass
    return 64 * 1024 * 1024  # conservative fallback (v7x per-TC VMEM)


# --------------------------------------------------------------------------
# kernel: grid = (N tiles [parallel], C tiles [arbitrary / reduction])
# --------------------------------------------------------------------------
def _mlp_kernel(x_ref, w1_ref, b1_ref, w2_ref, b2_ref, o_ref, acc_ref):
    k = pl.program_id(1)

    @pl.when(k == 0)
    def _init():
        acc_ref[...] = jnp.zeros_like(acc_ref)

    # Partial first matmul over the current C chunk (MXU, f32 accumulation).
    acc_ref[...] += jnp.dot(x_ref[...], w1_ref[...],
                            preferred_element_type=jnp.float32)

    @pl.when(k == pl.num_programs(1) - 1)
    def _finish():
        hdn = jnp.maximum(acc_ref[...] + b1_ref[...], 0.0)          # bias+ReLU (VPU)
        logits = jnp.dot(hdn, w2_ref[...],
                         preferred_element_type=jnp.float32)        # (tile_n, 2)
        o_ref[...] = (logits + b2_ref[...]).astype(o_ref.dtype)


# --------------------------------------------------------------------------
# Gradient Reversal Layer: identity forward, -lambda * grad backward.
# --------------------------------------------------------------------------
@jax.custom_vjp
def _gradient_reversal(x, lambda_):
    return x


def _grl_fwd(x, lambda_):
    return x, lambda_


def _grl_bwd(lambda_, g):
    return (-lambda_ * g, jnp.zeros_like(jnp.asarray(lambda_, dtype=g.dtype)))


_gradient_reversal.defvjp(_grl_fwd, _grl_bwd)


# --------------------------------------------------------------------------
# wrapper
# --------------------------------------------------------------------------
def instance_level_domain_classifier(x, w1, b1, w2, b2, lambda_=1.0, *,
                                     tile_n=4096):
    """Forward pass of InstanceLevelDomainClassifier.

    x : (N, C) instance (RoI-pooled, flattened) features.
    w1: (C, H), b1: (H,)   -- first Linear, stored as (in, out).
    w2: (H, 2), b2: (2,)   -- second Linear, stored as (in, out).
    Returns (N, 2) domain logits.
    """
    # GRL is identity in forward; custom_vjp flips the gradient w.r.t. x.
    # TODO(synk): backprop through the pallas_call (MLP x/weight grads) would
    # need a custom VJP for the kernel; forward-only here.
    x = _gradient_reversal(x, lambda_)

    n, c = x.shape
    h = w1.shape[1]
    n_out = w2.shape[1]

    b1r = b1.reshape(1, h)
    b2r = b2.reshape(1, n_out)

    x_isz = jnp.dtype(x.dtype).itemsize
    w_isz = jnp.dtype(w1.dtype).itemsize

    # --- generation-gated VMEM budgets (per TensorCore) -------------------
    vmem_cap = _vmem_capacity_bytes()
    vmem_limit = int(vmem_cap * 0.80)     # leave headroom for compiler scratch
    tile_budget = int(vmem_cap * 0.65)    # budget used for tile sizing

    # --- K (=C) tiling: w1 stays resident only when its *double-buffered*
    # footprint is a small fraction of the budget; otherwise stream it in
    # MXU-friendly chunks that divide C exactly (no ragged reduction reads).
    def _pick_tile_k():
        if 2 * _padded_bytes(c, h, w_isz) <= tile_budget // 3:
            return c
        for tk in (2048, 1024, 512, 256, 128):
            if c % tk == 0 and 2 * _padded_bytes(tk, h, w_isz) <= tile_budget // 3:
                return tk
        # TODO(synk): zero-pad C for arbitrary in_channels; resident fallback.
        return c

    tile_k = _pick_tile_k()
    grid_k = c // tile_k  # tile_k divides c by construction

    # --- N tiling: large aligned tiles, no host pad, >=2 steps when possible
    # (v7x megacore), shrunk until everything (double-buffered blocks +
    # weights + accumulator scratch) fits the per-core budget.
    align = 256 if n >= 256 else 8
    tile_n = max(align, min(_round_up(tile_n, align), _round_up(n, align)))
    if n >= 2 * align:
        tile_n = min(tile_n, _round_up(-(-n // 2), align))

    def _tile_bytes(tn):
        b = 2 * _padded_bytes(tn, tile_k, x_isz)       # x blocks (dbl buffered)
        b += 2 * _padded_bytes(tile_k, h, w_isz)       # w1 block(s)
        b += 2 * _padded_bytes(1, h, 4)                # b1
        b += 2 * _padded_bytes(h, n_out, 4)            # w2
        b += 2 * _padded_bytes(1, n_out, 4)            # b2
        b += 2 * _padded_bytes(tn, n_out, 4)           # out blocks
        b += _padded_bytes(tn, h, 4)                   # f32 accumulator scratch
        return b

    while tile_n > align and _tile_bytes(tile_n) > tile_budget:
        tile_n = max(align, _round_up(tile_n // 2, align))
    if tile_n > n:
        tile_n = n  # full-dim block is always legal

    grid = (pl.cdiv(n, tile_n), grid_k)

    cost = pl.CostEstimate(
        flops=int(2 * n * c * h + 2 * n * h * n_out),
        transcendentals=0,
        bytes_accessed=int(n * c * x_isz + c * h * w_isz
                           + (h + h * n_out + n_out) * 4
                           + n * n_out * x_isz),
    )

    out = pl.pallas_call(
        _mlp_kernel,
        out_shape=jax.ShapeDtypeStruct((n, n_out), x.dtype),
        grid=grid,
        in_specs=[
            # x streams over (N, C) tiles; Pallas double-buffers the DMA.
            pl.BlockSpec((tile_n, tile_k), lambda i, k: (i, k)),
            # w1 streams over C (or stays resident when grid_k == 1).
            pl.BlockSpec((tile_k, h), lambda i, k: (k, 0)),
            # Biases / second layer: constant index_map -> fetched once.
            pl.BlockSpec((1, h), lambda i, k: (0, 0)),
            pl.BlockSpec((h, n_out), lambda i, k: (0, 0)),
            pl.BlockSpec((1, n_out), lambda i, k: (0, 0)),
        ],
        # Narrow lane width == full second dim (legal); avoids padded writeback.
        out_specs=pl.BlockSpec((tile_n, n_out), lambda i, k: (i, 0)),
        scratch_shapes=[pltpu.VMEM((tile_n, h), jnp.float32)],
        compiler_params=pltpu.CompilerParams(
            dimension_semantics=("parallel", "arbitrary"),
            vmem_limit_bytes=vmem_limit,
        ),
        cost_estimate=cost,
    )(x, w1, b1r, w2, b2r)

    return out


def _reference(x, w1, b1, w2, b2):
    hdn = jnp.maximum(x @ w1 + b1, 0.0)
    return hdn @ w2 + b2


if __name__ == "__main__":
    # Small shapes consistent with the module: N RoI instances, C flattened
    # RoI feature size, hidden H.  N is deliberately not tile-aligned so the
    # ragged-tail path and multiple grid steps are exercised.
    N, C, H = 200, 64, 64

    key = jax.random.PRNGKey(0)
    kx, k1, k2, k3, k4 = jax.random.split(key, 5)

    x = jax.random.normal(kx, (N, C), dtype=jnp.float32)

    bound1 = 1.0 / jnp.sqrt(jnp.float32(C))
    bound2 = 1.0 / jnp.sqrt(jnp.float32(H))
    w1 = jax.random.uniform(k1, (C, H), jnp.float32, -bound1, bound1)
    b1 = jax.random.uniform(k2, (H,), jnp.float32, -bound1, bound1)
    w2 = jax.random.uniform(k3, (H, 2), jnp.float32, -bound2, bound2)
    b2 = jax.random.uniform(k4, (2,), jnp.float32, -bound2, bound2)

    out = instance_level_domain_classifier(x, w1, b1, w2, b2)
    out = jax.block_until_ready(out)

    ref = _reference(x, w1, b1, w2, b2)
    assert out.shape == (N, 2)
    assert jnp.allclose(out, ref, atol=1e-3, rtol=1e-3), float(
        jnp.max(jnp.abs(out - ref)))

    print("KERNEL_OK")
</pallas_src>

<mosaic_0001>
module attributes {stable_mosaic.version = 11 : i64} {
  func.func @_mlp_kernel(%arg0: i32, %arg1: i32, %arg2: memref<104x64xf32, #tpu.memory_space<vmem>>, %arg3: memref<64x64xf32, #tpu.memory_space<vmem>>, %arg4: memref<1x64xf32, #tpu.memory_space<vmem>>, %arg5: memref<64x2xf32, #tpu.memory_space<vmem>>, %arg6: memref<1x2xf32, #tpu.memory_space<vmem>>, %arg7: memref<104x2xf32, #tpu.memory_space<vmem>>, %arg8: memref<104x64xf32, #tpu.memory_space<vmem>>) attributes {dimension_semantics = [#tpu.dimension_semantics<parallel>, #tpu.dimension_semantics<arbitrary>], iteration_bounds = array<i64: 2, 1>, scalar_prefetch = 0 : i64, scratch_operands = 1 : i64, tpu.core_type = #tpu.core_type<tc>, window_params = [{transform_indices = @transform_0, window_bounds = array<i64: 104, 64>}, {transform_indices = @transform_1, window_bounds = array<i64: 64, 64>}, {pipeline_mode = #tpu.pipeline_mode<synchronous>, transform_indices = @transform_2, window_bounds = array<i64: 1, 64>}, {pipeline_mode = #tpu.pipeline_mode<synchronous>, transform_indices = @transform_3, window_bounds = array<i64: 64, 2>}, {pipeline_mode = #tpu.pipeline_mode<synchronous>, transform_indices = @transform_4, window_bounds = array<i64: 1, 2>}, {transform_indices = @transform_5, window_bounds = array<i64: 104, 2>}]} {
    %c0_i32 = arith.constant 0 : i32
    %0 = arith.cmpi eq, %arg1, %c0_i32 : i32
    %1 = arith.extui %0 : i1 to i32
    %c0_i32_0 = arith.constant 0 : i32
    %2 = arith.cmpi ne, %1, %c0_i32_0 : i32
    scf.if %2 {
      %cst_10 = arith.constant 0.000000e+00 : f32
      %12 = vector.broadcast %cst_10 : f32 to vector<104x64xf32>
      %c0_11 = arith.constant 0 : index
      %c0_12 = arith.constant 0 : index
      %13 = vector.load %arg8[%c0_11, %c0_12] : memref<104x64xf32, #tpu.memory_space<vmem>>, vector<104x64xf32>
      tpu.vector_store %arg8[%c0_11, %c0_12], %12 {strides = array<i32>} : memref<104x64xf32, #tpu.memory_space<vmem>>, vector<104x64xf32>,
    } else {
    }
    %c0 = arith.constant 0 : index
    %c0_1 = arith.constant 0 : index
    %3 = vector.load %arg8[%c0, %c0_1] : memref<104x64xf32, #tpu.memory_space<vmem>>, vector<104x64xf32>
    %c0_2 = arith.constant 0 : index
    %c0_3 = arith.constant 0 : index
    %4 = vector.load %arg2[%c0_2, %c0_3] : memref<104x64xf32, #tpu.memory_space<vmem>>, vector<104x64xf32>
    %c0_4 = arith.constant 0 : index
    %c0_5 = arith.constant 0 : index
    %5 = vector.load %arg3[%c0_4, %c0_5] : memref<64x64xf32, #tpu.memory_space<vmem>>, vector<64x64xf32>
    %cst = arith.constant dense<0.000000e+00> : vector<104x64xf32>
    %6 = tpu.matmul %4, %5, %cst {dimension_numbers = #tpu.dot_dimension_numbers<[1], [0], [0], [1], [0, 0, 1, 1], [], []>} : vector<104x64xf32>, vector<64x64xf32>, vector<104x64xf32> -> vector<104x64xf32>
    %7 = arith.addf %3, %6 : vector<104x64xf32>
    %c0_6 = arith.constant 0 : index
    %c0_7 = arith.constant 0 : index
    %8 = vector.load %arg8[%c0_6, %c0_7] : memref<104x64xf32, #tpu.memory_space<vmem>>, vector<104x64xf32>
    tpu.vector_store %arg8[%c0_6, %c0_7], %7 {strides = array<i32>} : memref<104x64xf32, #tpu.memory_space<vmem>>, vector<104x64xf32>,
    %c0_i32_8 = arith.constant 0 : i32
    %9 = arith.cmpi eq, %arg1, %c0_i32_8 : i32
    %10 = arith.extui %9 : i1 to i32
    %c0_i32_9 = arith.constant 0 : i32
    %11 = arith.cmpi ne, %10, %c0_i32_9 : i32
    scf.if %11 {
      %c0_10 = arith.constant 0 : index
      %c0_11 = arith.constant 0 : index
      %12 = vector.load %arg8[%c0_10, %c0_11] : memref<104x64xf32, #tpu.memory_space<vmem>>, vector<104x64xf32>
      %c0_12 = arith.constant 0 : index
      %c0_13 = arith.constant 0 : index
      %13 = vector.load %arg4[%c0_12, %c0_13] : memref<1x64xf32, #tpu.memory_space<vmem>>, vector<1x64xf32>
      %14 = vector.broadcast %13 : vector<1x64xf32> to vector<104x64xf32>
      %15 = arith.addf %12, %14 : vector<104x64xf32>
      %cst_14 = arith.constant 0.000000e+00 : f32
      %16 = vector.broadcast %cst_14 : f32 to vector<104x64xf32>
      %17 = arith.maximumf %15, %16 : vector<104x64xf32>
      %c0_15 = arith.constant 0 : index
      %c0_16 = arith.constant 0 : index
      %18 = vector.load %arg5[%c0_15, %c0_16] : memref<64x2xf32, #tpu.memory_space<vmem>>, vector<64x2xf32>
      %cst_17 = arith.constant dense<0.000000e+00> : vector<104x2xf32>
      %19 = tpu.matmul %17, %18, %cst_17 {dimension_numbers = #tpu.dot_dimension_numbers<[1], [0], [0], [1], [0, 0, 1, 1], [], []>} : vector<104x64xf32>, vector<64x2xf32>, vector<104x2xf32> -> vector<104x2xf32>
      %c0_18 = arith.constant 0 : index
      %c0_19 = arith.constant 0 : index
      %20 = vector.load %arg6[%c0_18, %c0_19] : memref<1x2xf32, #tpu.memory_space<vmem>>, vector<1x2xf32>
      %21 = vector.broadcast %20 : vector<1x2xf32> to vector<104x2xf32>
      %22 = arith.addf %19, %21 : vector<104x2xf32>
      %c0_20 = arith.constant 0 : index
      %c0_21 = arith.constant 0 : index
      %23 = vector.load %arg7[%c0_20, %c0_21] : memref<104x2xf32, #tpu.memory_space<vmem>>, vector<104x2xf32>
      tpu.vector_store %arg7[%c0_20, %c0_21], %22 {strides = array<i32>} : memref<104x2xf32, #tpu.memory_space<vmem>>, vector<104x2xf32>,
    } else {
    }
    return
  }
  func.func @transform_0(%arg0: i32, %arg1: i32) -> (i32, i32) {
    %c0_i32 = arith.constant 0 : i32
    return %arg0, %arg1 : i32, i32
  }
  func.func @transform_1(%arg0: i32, %arg1: i32) -> (i32, i32) {
    %c0_i32 = arith.constant 0 : i32
    %c0_i32_0 = arith.constant 0 : i32
    return %arg1, %c0_i32 : i32, i32
  }
  func.func @transform_2(%arg0: i32, %arg1: i32) -> (i32, i32) {
    %c0_i32 = arith.constant 0 : i32
    %c0_i32_0 = arith.constant 0 : i32
    %c0_i32_1 = arith.constant 0 : i32
    return %c0_i32, %c0_i32_0 : i32, i32
  }
  func.func @transform_3(%arg0: i32, %arg1: i32) -> (i32, i32) {
    %c0_i32 = arith.constant 0 : i32
    %c0_i32_0 = arith.constant 0 : i32
    %c0_i32_1 = arith.constant 0 : i32
    return %c0_i32, %c0_i32_0 : i32, i32
  }
  func.func @transform_4(%arg0: i32, %arg1: i32) -> (i32, i32) {
    %c0_i32 = arith.constant 0 : i32
    %c0_i32_0 = arith.constant 0 : i32
    %c0_i32_1 = arith.constant 0 : i32
    return %c0_i32, %c0_i32_0 : i32, i32
  }
  func.func @transform_5(%arg0: i32, %arg1: i32) -> (i32, i32) {
    %c0_i32 = arith.constant 0 : i32
    %c0_i32_0 = arith.constant 0 : i32
    return %arg0, %c0_i32 : i32, i32
  }
}

</mosaic_0001>

<bundles_post_ra>
// kernel: tpu_custom_call.1
= control target key start
LH: loop header
LB: loop body
LE: loop exit
PB: predicated region body
PF: predicated region fallthrough
CT: control target
= control target key end

     0   :  { %s1551_s18 = smov 0   ;;  %s1553_s19 = smov 0   ;;  %s1934_s0 = inlined_call_operand.vmem [shape: f32[200,64], index: 0, kind: input, shape index: {}]   ;;  %s1935_s1 = inlined_call_operand.vmem [shape: f32[64,64], index: 1, kind: input, shape index: {}]   ;;  %s1936_s2 = inlined_call_operand.vmem [shape: f32[1,64], index: 2, kind: input, shape index: {}]   ;;  %s1937_s3 = inlined_call_operand.vmem [shape: f32[64,2], index: 3, kind: input, shape index: {}]   ;;  %s1938_s4 = inlined_call_operand.vmem [shape: f32[1,2], index: 4, kind: input, shape index: {}]   ;;  %s1939_s5 = inlined_call_operand.vmem [shape: f32[200,2], index: 5, kind: output, shape index: {}]  }
   0x1   :  { %s1555_s20 = smov 0   ;;  %s1557_s21 = smov 0  }
   0x2   :  { %s1559_s22 = smov 0  }
   0x3 LB: > { %s1077_s23 = sadd.s32 4294967295, %s1484_s22   ;;  %s27_s24 = sadd.s32 1, %s1480_s21  ;;  %s1484_s22 = sphi %s1559_s22, %s15_s22   ;;  %s1480_s21 = sphi %s1557_s21, %s1947_s21   ;;  %s1476_s20 = sphi %s1555_s20, %s1946_s20   ;;  %s1472_s19 = sphi %s1553_s19, %s1945_s19   ;;  %s1468_s18 = sphi %s1551_s18, %s1944_s18  }
   0x4   : > { %p29_p0 = scmp.ge.s32.totalorder %s27_s24, 2  ;;  %s151_s25 = sadd.s32 1, %s1472_s19 }
   0x5   : > { %p161_p1 = scmp.ne.s32.totalorder %s1472_s19, %s1468_s18  ;;  %p162_p2 = scmp.eq.s32.totalorder %s1077_s23, 1 }
   0x6   : > { %s1949_s24 = smov (%p29_p0, %s27_s24), 0  ;;  %p1082_p4 = scmp.ge.s32.totalorder %s1484_s22, 1 }
   0x7   : > { %p1583_p3 = por %p162_p2, %p161_p1  ;;  %s148_s27 = ssub.s32 %s1480_s21, %s1949_s24 }
   0x8   : > { %p224_p5 = scmp.lt.s32.totalorder %s1484_s22, 3  ;;  %p149_p6 = scmp.eq.s32.totalorder %s148_s27, 0 }
   0xa   : > { %p225_p7 = pnand %p1082_p4, %p224_p5 }
   0xb   : > { %s1592_s28 = scalar_select %p149_p6, %s1472_s19, %s151_s25  }
   0xc   : > { %228 = sbr.rel (%p225_p7) target bundleno = 580 (0x244), region = 40  ;;  %v335_v0 = vld [vmem:[%s1935_s1] sm:$0xff] (!%p225_p7)  ;;  %v336_v1 = vld [vmem:[%s1935_s1 + $0x8] sm:$0xff] (!%p225_p7)  ;;  %v337_v2 = vld [vmem:[%s1935_s1 + $0x10] sm:$0xff] (!%p225_p7)  ;;  %v1518_v3 = vmov (!%p225_p7), 0.0|0.0   ;;  %vm1519_vm0 = vmmov (!%p225_p7), 0  }
   0xd   : > { %1277 = vmatprep.subr.bf16.mxu0 (!%p225_p7), %v1518_v3  ;;  %v1278_v4 = vpack.c.bf16 (!%p225_p7), %v336_v1, %v335_v0  ;;  %v338_v5 = vld [vmem:[%s1935_s1 + $0x18] sm:$0xff] (!%p225_p7)  ;;  %v1520_v6 = vmov (!%p225_p7), 0.0   ;;  %s1610_s12 = smul.u32 (!%p225_p7), 13, %s1476_s20  ;;  %vm295_vm1 = vcmask (!%p225_p7), 523264   ;;  %1289 = vmatprep.subr.bf16.mxu1 (!%p225_p7), %v1518_v3  ;;  %v339_v8 = vld [vmem:[%s1935_s1 + $0x20] sm:$0xff] (!%p225_p7)  ;;  %v340_v9 = vld [vmem:[%s1935_s1 + $0x28] sm:$0xff] (!%p225_p7) }
   0xe   : > { %1183 = vmatprep.mubr.msk.f32.mxu0 (!%p225_p7), %vm1519_vm0, %v1520_v6  ;;  %296 = vst.msk [vmem:[#allocation2] sm:$0xff] (!%p225_p7), %vm295_vm1, %v1520_v6  ;;  %297 = vst.msk [vmem:[#allocation2 + $0x8] sm:$0xff] (!%p225_p7), %vm295_vm1, %v1520_v6  ;;  %1238 = vmatprep.mubr.msk.f32.mxu1 (!%p225_p7), %vm1519_vm0, %v1520_v6  ;;  %v1281_v7 = vpack.c.bf16 (!%p225_p7), %v338_v5, %v337_v2  ;;  %v1284_v10 = vpack.c.bf16 (!%p225_p7), %v340_v9, %v339_v8  ;;  %v341_v11 = vld [vmem:[%s1935_s1 + $0x30] sm:$0xff] (!%p225_p7)  ;;  %v342_v12 = vld [vmem:[%s1935_s1 + $0x38] sm:$0xff] (!%p225_p7)  ;;  %s260_s11 = sand.u32 (!%p225_p7), 1, %s1468_s18   ;;  %vm772_vm2 = vcmask (!%p225_p7), 15360  }
   0xf   : > { %298 = vst.msk [vmem:[#allocation2 + $0x10] sm:$0xff] (!%p225_p7), %vm295_vm1, %v1520_v6  ;;  %299 = vst.msk [vmem:[#allocation2 + $0x18] sm:$0xff] (!%p225_p7), %vm295_vm1, %v1520_v6  ;;  %1279 = vmatpush3.bf16.msra.mxu0 (!%p225_p7), %v1278_v4  ;;  %p268_p8 = scmp.lt.s32.totalorder (!%p225_p7), %s1610_s12, 24  ;;  %v1287_v13 = vpack.c.bf16 (!%p225_p7), %v342_v12, %v341_v11  ;;  %v588_v27 = vld [vmem:[%s1937_s3] sm:$0xff] (!%p225_p7)  ;;  %v589_v28 = vld [vmem:[%s1937_s3 + $0x8] sm:$0xff] (!%p225_p7)  ;;  %s1301_s13 = smul.u32 (!%p225_p7), 104, %s260_s11 }
  0x10   : > { %300 = vst.msk [vmem:[#allocation2 + $0x20] sm:$0xff] (!%p225_p7), %vm295_vm1, %v1520_v6  ;;  %301 = vst.msk [vmem:[#allocation2 + $0x28] sm:$0xff] (!%p225_p7), %vm295_vm1, %v1520_v6  ;;  %1280 = vmatprep.subr.bf16.mxu0 (!%p225_p7), %v1518_v3  ;;  %v1290_v29 = vpack.c.bf16 (!%p225_p7), %v589_v28, %v588_v27  ;;  %v590_v30 = vld [vmem:[%s1937_s3 + $0x10] sm:$0xff] (!%p225_p7)  ;;  %v591_v31 = vld [vmem:[%s1937_s3 + $0x18] sm:$0xff] (!%p225_p7) }
  0x11   : > { %302 = vst.msk [vmem:[#allocation2 + $0x30] sm:$0xff] (!%p225_p7), %vm295_vm1, %v1520_v6  ;;  %303 = vst.msk [vmem:[#allocation2 + $0x38] sm:$0xff] (!%p225_p7), %vm295_vm1, %v1520_v6  ;;  %v1293_v32 = vpack.c.bf16 (!%p225_p7), %v591_v31, %v590_v30  ;;  %v592_v33 = vld [vmem:[%s1937_s3 + $0x20] sm:$0xff] (!%p225_p7)  ;;  %v593_v34 = vld [vmem:[%s1937_s3 + $0x28] sm:$0xff] (!%p225_p7)  ;;  %s1812_s16 = scalar_lea.vmem (!%p225_p7), [#allocation3], %s1301_s13  }
  0x12   : > { %304 = vst.msk [vmem:[#allocation2 + $0x40] sm:$0xff] (!%p225_p7), %vm295_vm1, %v1520_v6  ;;  %305 = vst.msk [vmem:[#allocation2 + $0x48] sm:$0xff] (!%p225_p7), %vm295_vm1, %v1520_v6  ;;  %1291 = vmatpush3.bf16.msra.mxu1 (!%p225_p7), %v1290_v29  ;;  %v1296_v35 = vpack.c.bf16 (!%p225_p7), %v593_v34, %v592_v33  ;;  %v594_v36 = vld [vmem:[%s1937_s3 + $0x30] sm:$0xff] (!%p225_p7)  ;;  %v595_v37 = vld [vmem:[%s1937_s3 + $0x38] sm:$0xff] (!%p225_p7) }
  0x13   : > { %306 = vst.msk [vmem:[#allocation2 + $0x50] sm:$0xff] %vm295_vm1, %v1520_v6  ;;  %307 = vst.msk [vmem:[#allocation2 + $0x58] sm:$0xff] %vm295_vm1, %v1520_v6  ;;  %s269_s17 = scalar_select %p268_p8, %s1610_s12, 24  ;;  %1282 = vmatpush3.bf16.msra.mxu0 %v1281_v7  ;;  %1292 = vmatprep.subr.bf16.mxu1 %v1518_v3  ;;  %v1299_v38 = vpack.c.bf16 %v595_v37, %v594_v36  ;;  %v1745_v49 = vld [vmem:[%s1936_s2] ss:$0 sm:$0xff] }
  0x14   : > { %308 = vst.msk [vmem:[#allocation2 + $0x60] sm:$0xff] %vm295_vm1, %v1520_v6  ;;  %1283 = vmatprep.subr.bf16.mxu0 %v1518_v3  ;;  %s794_s18 = ssub.s32 (%p1583_p3), 25, %s1610_s12 }
  0x15   : > { %s1083_s30 = sshll.u32 %s269_s17, 3  ;;  %v309_v39 = vld [vmem:[#allocation2] sm:$0xff]  ;;  %v310_v43 = vld [vmem:[#allocation2 + $0x8] sm:$0xff]  ;;  %s1124_s17 = smul.u32 (%p1583_p3), 104, %s1476_s20 }
  0x16   : > { %s1661_s8 = scalar_lea.vmem %s1934_s0, %s1083_s30  ;;  %1294 = vmatpush3.bf16.msra.mxu1 %v1293_v32  ;;  %v311_v47 = vld [vmem:[#allocation2 + $0x10] sm:$0xff]  ;;  %v312_v52 = vld [vmem:[#allocation2 + $0x18] sm:$0xff]  ;;  %p795_p9 = scmp.lt.s32.totalorder (%p1583_p3), %s794_s18, 13 }
  0x17   : > { %1285 = vmatpush3.bf16.msra.mxu0 %v1284_v10  ;;  %v322_v14 = vld [vmem:[%s1661_s8] sm:$0xff]  ;;  %v323_v15 = vld [vmem:[%s1661_s8 + $0x8] sm:$0xff]  ;;  %v324_v16 = vld [vmem:[%s1661_s8 + $0x10] sm:$0xff]  ;;  %1295 = vmatprep.subr.bf16.mxu1 %v1518_v3  ;;  %s1847_s27 = scalar_lea.vmem (%p1583_p3), %s1939_s5, %s1124_s17  }
  0x18   : > { %1286 = vmatprep.subr.bf16.mxu0 %v1518_v3  ;;  %v325_v17 = vld [vmem:[%s1661_s8 + $0x18] sm:$0xff]  ;;  %v326_v18 = vld [vmem:[%s1661_s8 + $0x20] sm:$0xff]  ;;  %v327_v19 = vld [vmem:[%s1661_s8 + $0x28] sm:$0xff] }
  0x19   : > { %v328_v20 = vld [vmem:[%s1661_s8 + $0x30] sm:$0xff]  ;;  %v329_v21 = vld [vmem:[%s1661_s8 + $0x38] sm:$0xff]  ;;  %v330_v22 = vld [vmem:[%s1661_s8 + $0x40] sm:$0xff] }
  0x1a   : > { %v331_v23 = vld [vmem:[%s1661_s8 + $0x48] sm:$0xff]  ;;  %v332_v24 = vld [vmem:[%s1661_s8 + $0x50] sm:$0xff]  ;;  %v333_v25 = vld [vmem:[%s1661_s8 + $0x58] sm:$0xff]  ;;  %1297 = vmatpush3.bf16.msra.mxu1 %v1296_v35 }
  0x1b   : > { %1288 = vmatpush3.bf16.msra.mxu0 %v1287_v13  ;;  %v334_v26 = vld [vmem:[%s1661_s8 + $0x60] sm:$0xff]  ;;  %1298 = vmatprep.subr.bf16.mxu1 %v1518_v3  ;;  %v314_v2 = vld [vmem:[#allocation2 + $0x28] sm:$0xff]  ;;  %v315_v10 = vld [vmem:[#allocation2 + $0x30] sm:$0xff] }
  0x1c   : > { %v313_v59 = vld [vmem:[#allocation2 + $0x20] sm:$0xff]  ;;  %v318_v31 = vld [vmem:[#allocation2 + $0x48] sm:$0xff] }
  0x1e   : > { %1184 = vmatmul.mubr.msk.f32.vlgmr.msra.gmra.mrb[0].mxu0 %vm295_vm1, %v322_v14  ;;  %1300 = vmatpush3.bf16.msra.mxu1 %v1299_v38  ;;  %v319_v38 = vld [vmem:[#allocation2 + $0x50] sm:$0xff] }
  0x1f   : > { %1186 = vmatprep.mubr.msk.f32.mxu0 %vm1519_vm0, %v1520_v6 }
  0x22   : > { %1187 = vmatmul.mubr.msk.f32.gmra.mrb[2].mxu0 %vm295_vm1, %v323_v15 }
  0x23   : > { %1189 = vmatprep.mubr.msk.f32.mxu0 %vm1519_vm0, %v1520_v6 }
  0x26   : > { %1190 = vmatmul.mubr.msk.f32.gmra.mrb[4].mxu0 %vm295_vm1, %v324_v16 }
  0x27   : > { %1192 = vmatprep.mubr.msk.f32.mxu0 %vm1519_vm0, %v1520_v6 }
  0x2a   : > { %1193 = vmatmul.mubr.msk.f32.gmra.mrb[6].mxu0 %vm295_vm1, %v325_v17  ;;  %v316_v17 = vld [vmem:[#allocation2 + $0x38] sm:$0xff] }
  0x2b   : > { %1195 = vmatprep.mubr.msk.f32.mxu0 %vm1519_vm0, %v1520_v6 }
  0x2e   : > { %1196 = vmatmul.mubr.msk.f32.gmra.mrb[8].mxu0 %vm295_vm1, %v326_v18 }
  0x2f   : > { %1198 = vmatprep.mubr.msk.f32.mxu0 %vm1519_vm0, %v1520_v6 }
  0x32   : > { %1199 = vmatmul.mubr.msk.f32.gmra.mrb[10].mxu0 %vm295_vm1, %v327_v19 }
  0x33   : > { %1201 = vmatprep.mubr.msk.f32.mxu0 %vm1519_vm0, %v1520_v6 }
  0x36   : > { %1202 = vmatmul.mubr.msk.f32.gmra.mrb[12].mxu0 %vm295_vm1, %v328_v20 }
  0x37   : > { %1204 = vmatprep.mubr.msk.f32.mxu0 %vm1519_vm0, %v1520_v6 }
  0x3a   : > { %1205 = vmatmul.mubr.msk.f32.gmra.mrb[14].mxu0 %vm295_vm1, %v329_v21 }
  0x3b   : > { %1207 = vmatprep.mubr.msk.f32.mxu0 %vm1519_vm0, %v1520_v6 }
  0x3e   : > { %1208 = vmatmul.mubr.msk.f32.gmra.mrb[16].mxu0 %vm295_vm1, %v330_v22 }
  0x3f   : > { %1210 = vmatprep.mubr.msk.f32.mxu0 %vm1519_vm0, %v1520_v6 }
  0x42   : > { %1211 = vmatmul.mubr.msk.f32.gmra.mrb[18].mxu0 %vm295_vm1, %v331_v23 }
  0x43   : > { %1213 = vmatprep.mubr.msk.f32.mxu0 %vm1519_vm0, %v1520_v6 }
  0x46   : > { %1214 = vmatmul.mubr.msk.f32.gmra.mrb[20].mxu0 %vm295_vm1, %v332_v24  ;;  %v317_v24 = vld [vmem:[#allocation2 + $0x40] sm:$0xff] }
  0x47   : > { %1216 = vmatprep.mubr.msk.f32.mxu0 %vm1519_vm0, %v1520_v6 }
  0x4a   : > { %1217 = vmatmul.mubr.msk.f32.gmra.mrb[22].mxu0 %vm295_vm1, %v333_v25 }
  0x4b   : > { %1219 = vmatprep.mubr.msk.f32.mxu0 %vm1519_vm0, %v1520_v6 }
  0x4e   : > { %1220 = vmatmul.mubr.msk.f32.gmra.mrb[24].mxu0 %vm295_vm1, %v334_v26 }
  0xf1   : > { %v449_v40 = vpop.f32.mrb[0].mxu0 }
  0xf2   : > { %v513_v41 = vadd.f32 %v449_v40, %v309_v39  ;;  %v1185_v42 = vpop.f32.mrb[1].mxu0 }
  0xf4   : > { %526 = vst.msk [vmem:[#allocation2] sm:$0xff] %vm295_vm1, %v513_v41 }
  0xf5   : > { %v454_v44 = vpop.f32.mrb[2].mxu0 }
  0xf6   : > { %v514_v45 = vadd.f32 %v454_v44, %v310_v43  ;;  %v1188_v46 = vpop.f32.mrb[3].mxu0 }
  0xf8   : > { %527 = vst.msk [vmem:[#allocation2 + $0x8] sm:$0xff] %vm295_vm1, %v514_v45  ;;  %v320_v45 = vld [vmem:[#allocation2 + $0x58] sm:$0xff] }
  0xf9   : > { %v459_v48 = vpop.f32.mrb[4].mxu0 }
  0xfa   : > { %v515_v50 = vadd.f32 %v459_v48, %v311_v47  ;;  %v1191_v51 = vpop.f32.mrb[5].mxu0 }
  0xfb   : > { %v542_v53 = vld [vmem:[#allocation2] sm:$0xff] }
  0xfc   : > { %528 = vst.msk [vmem:[#allocation2 + $0x10] sm:$0xff] %vm295_vm1, %v515_v50  ;;  %v562_v54 = vadd.f32 %v1745_v49, %v542_v53  ;;  %v321_v53 = vld [vmem:[#allocation2 + $0x60] sm:$0xff] }
  0xfd   : > { %v464_v55 = vpop.f32.mrb[6].mxu0 }
  0xfe   : > { %v516_v56 = vadd.f32 %v464_v55, %v312_v52  ;;  %v1194_v57 = vpop.f32.mrb[7].mxu0  ;;  %v575_v58 = vmax.f32 %v562_v54, 0.0 }
  0xff   : > { %v543_v60 = vld [vmem:[#allocation2 + $0x8] sm:$0xff] }
 0x100   : > { %529 = vst.msk [vmem:[#allocation2 + $0x18] sm:$0xff] %vm295_vm1, %v516_v56  ;;  %1239 = vmatmul.mubr.msk.f32.vlgmr.msra.gmra.mrb[0].mxu1 %vm295_vm1, %v575_v58  ;;  %v563_v61 = vadd.f32 %v1745_v49, %v543_v60 }
 0x101   : > { %v469_v62 = vpop.f32.mrb[8].mxu0  ;;  %1241 = vmatprep.mubr.msk.f32.mxu1 %vm1519_vm0, %v1520_v6 }
 0x102   : > { %v517_v63 = vadd.f32 %v469_v62, %v313_v59  ;;  %v1197_v0 = vpop.f32.mrb[9].mxu0  ;;  %v576_v1 = vmax.f32 %v563_v61, 0.0 }
 0x103   : > { %v544_v3 = vld [vmem:[#allocation2 + $0x10] sm:$0xff] }
 0x104   : > { %530 = vst.msk [vmem:[#allocation2 + $0x20] sm:$0xff] %vm295_vm1, %v517_v63  ;;  %1242 = vmatmul.mubr.msk.f32.gmra.mrb[2].mxu1 %vm295_vm1, %v576_v1  ;;  %v564_v4 = vadd.f32 %v1745_v49, %v544_v3 }
 0x105   : > { %v474_v5 = vpop.f32.mrb[10].mxu0  ;;  %1244 = vmatprep.mubr.msk.f32.mxu1 %vm1519_vm0, %v1520_v6 }
 0x106   : > { %v518_v7 = vadd.f32 %v474_v5, %v314_v2  ;;  %v1200_v8 = vpop.f32.mrb[11].mxu0  ;;  %v577_v9 = vmax.f32 %v564_v4, 0.0  ;;  %v1098_v5 = vld [vmem:[%s1938_s4] ss:$0 sm:$0xff] }
 0x107   : > { %v545_v11 = vld [vmem:[#allocation2 + $0x18] sm:$0xff] }
 0x108   : > { %531 = vst.msk [vmem:[#allocation2 + $0x28] sm:$0xff] %vm295_vm1, %v518_v7  ;;  %1245 = vmatmul.mubr.msk.f32.gmra.mrb[4].mxu1 %vm295_vm1, %v577_v9  ;;  %v565_v12 = vadd.f32 %v1745_v49, %v545_v11 }
 0x109   : > { %v479_v13 = vpop.f32.mrb[12].mxu0  ;;  %1247 = vmatprep.mubr.msk.f32.mxu1 %vm1519_vm0, %v1520_v6 }
 0x10a   : > { %v519_v14 = vadd.f32 %v479_v13, %v315_v10  ;;  %v1203_v15 = vpop.f32.mrb[13].mxu0  ;;  %v578_v16 = vmax.f32 %v565_v12, 0.0 }
 0x10b   : > { %v546_v18 = vld [vmem:[#allocation2 + $0x20] sm:$0xff] }
 0x10c   : > { %532 = vst.msk [vmem:[#allocation2 + $0x30] sm:$0xff] %vm295_vm1, %v519_v14  ;;  %1248 = vmatmul.mubr.msk.f32.gmra.mrb[6].mxu1 %vm295_vm1, %v578_v16  ;;  %v566_v19 = vadd.f32 %v1745_v49, %v546_v18 }
 0x10d   : > { %v484_v20 = vpop.f32.mrb[14].mxu0  ;;  %1250 = vmatprep.mubr.msk.f32.mxu1 %vm1519_vm0, %v1520_v6 }
 0x10e   : > { %v520_v21 = vadd.f32 %v484_v20, %v316_v17  ;;  %v1206_v22 = vpop.f32.mrb[15].mxu0  ;;  %v579_v23 = vmax.f32 %v566_v19, 0.0 }
 0x10f   : > { %v547_v25 = vld [vmem:[#allocation2 + $0x28] sm:$0xff] }
 0x110   : > { %533 = vst.msk [vmem:[#allocation2 + $0x38] sm:$0xff] %vm295_vm1, %v520_v21  ;;  %1251 = vmatmul.mubr.msk.f32.gmra.mrb[8].mxu1 %vm295_vm1, %v579_v23  ;;  %v567_v26 = vadd.f32 %v1745_v49, %v547_v25 }
 0x111   : > { %v489_v27 = vpop.f32.mrb[16].mxu0  ;;  %1253 = vmatprep.mubr.msk.f32.mxu1 %vm1519_vm0, %v1520_v6 }
 0x112   : > { %v521_v28 = vadd.f32 %v489_v27, %v317_v24  ;;  %v1209_v29 = vpop.f32.mrb[17].mxu0  ;;  %v580_v30 = vmax.f32 %v567_v26, 0.0 }
 0x113   : > { %v548_v32 = vld [vmem:[#allocation2 + $0x30] sm:$0xff] }
 0x114   : > { %534 = vst.msk [vmem:[#allocation2 + $0x40] sm:$0xff] %vm295_vm1, %v521_v28  ;;  %1254 = vmatmul.mubr.msk.f32.gmra.mrb[10].mxu1 %vm295_vm1, %v580_v30  ;;  %v568_v33 = vadd.f32 %v1745_v49, %v548_v32 }
 0x115   : > { %v494_v34 = vpop.f32.mrb[18].mxu0  ;;  %1256 = vmatprep.mubr.msk.f32.mxu1 %vm1519_vm0, %v1520_v6 }
 0x116   : > { %v522_v35 = vadd.f32 %v494_v34, %v318_v31  ;;  %v1212_v36 = vpop.f32.mrb[19].mxu0  ;;  %v581_v37 = vmax.f32 %v568_v33, 0.0 }
 0x117   : > { %v549_v39 = vld [vmem:[#allocation2 + $0x38] sm:$0xff] }
 0x118   : > { %535 = vst.msk [vmem:[#allocation2 + $0x48] sm:$0xff] %vm295_vm1, %v522_v35  ;;  %1257 = vmatmul.mubr.msk.f32.gmra.mrb[12].mxu1 %vm295_vm1, %v581_v37  ;;  %v569_v40 = vadd.f32 %v1745_v49, %v549_v39 }
 0x119   : > { %v499_v41 = vpop.f32.mrb[20].mxu0  ;;  %1259 = vmatprep.mubr.msk.f32.mxu1 %vm1519_vm0, %v1520_v6 }
 0x11a   : > { %v523_v42 = vadd.f32 %v499_v41, %v319_v38  ;;  %v1215_v43 = vpop.f32.mrb[21].mxu0  ;;  %v582_v44 = vmax.f32 %v569_v40, 0.0 }
 0x11b   : > { %v550_v46 = vld [vmem:[#allocation2 + $0x40] sm:$0xff] }
 0x11c   : > { %536 = vst.msk [vmem:[#allocation2 + $0x50] sm:$0xff] %vm295_vm1, %v523_v42  ;;  %1260 = vmatmul.mubr.msk.f32.gmra.mrb[14].mxu1 %vm295_vm1, %v582_v44  ;;  %v570_v47 = vadd.f32 %v1745_v49, %v550_v46 }
 0x11d   : > { %v504_v48 = vpop.f32.mrb[22].mxu0  ;;  %1262 = vmatprep.mubr.msk.f32.mxu1 %vm1519_vm0, %v1520_v6 }
 0x11e   : > { %v524_v50 = vadd.f32 %v504_v48, %v320_v45  ;;  %v1218_v51 = vpop.f32.mrb[23].mxu0  ;;  %v583_v52 = vmax.f32 %v570_v47, 0.0 }
 0x11f   : > { %v551_v54 = vld [vmem:[#allocation2 + $0x48] sm:$0xff] }
 0x120   : > { %537 = vst.msk [vmem:[#allocation2 + $0x58] sm:$0xff] %vm295_vm1, %v524_v50  ;;  %1263 = vmatmul.mubr.msk.f32.gmra.mrb[16].mxu1 %vm295_vm1, %v583_v52  ;;  %v571_v55 = vadd.f32 %v1745_v49, %v551_v54 }
 0x121   : > { %v509_v56 = vpop.f32.mrb[24].mxu0  ;;  %1265 = vmatprep.mubr.msk.f32.mxu1 %vm1519_vm0, %v1520_v6 }
 0x122   : > { %v525_v57 = vadd.f32 %v509_v56, %v321_v53  ;;  %v1221_v58 = vpop.f32.mrb[25].mxu0  ;;  %v584_v59 = vmax.f32 %v571_v55, 0.0 }
 0x123   : > { %v552_v60 = vld [vmem:[#allocation2 + $0x50] sm:$0xff] }
 0x124   : > { %538 = vst.msk [vmem:[#allocation2 + $0x60] sm:$0xff] %vm295_vm1, %v525_v57  ;;  %1266 = vmatmul.mubr.msk.f32.gmra.mrb[18].mxu1 %vm295_vm1, %v584_v59  ;;  %v572_v61 = vadd.f32 %v1745_v49, %v552_v60 }
 0x125   : > { %1268 = vmatprep.mubr.msk.f32.mxu1 %vm1519_vm0, %v1520_v6 }
 0x126   : > { %v585_v62 = vmax.f32 %v572_v61, 0.0 }
 0x127   : > { %v553_v63 = vld [vmem:[#allocation2 + $0x58] sm:$0xff] }
 0x128   : > { %1269 = vmatmul.mubr.msk.f32.gmra.mrb[20].mxu1 %vm295_vm1, %v585_v62  ;;  %v573_v0 = vadd.f32 %v1745_v49, %v553_v63 }
 0x129   : > { %1271 = vmatprep.mubr.msk.f32.mxu1 %vm1519_vm0, %v1520_v6 }
 0x12a   : > { %v586_v1 = vmax.f32 %v573_v0, 0.0 }
 0x12b   : > { %v554_v2 = vld [vmem:[#allocation2 + $0x60] sm:$0xff] }
 0x12c   : > { %1272 = vmatmul.mubr.msk.f32.gmra.mrb[22].mxu1 %vm295_vm1, %v586_v1  ;;  %v574_v3 = vadd.f32 %v1745_v49, %v554_v2 }
 0x12d   : > { %1274 = vmatprep.mubr.msk.f32.mxu1 %vm1519_vm0, %v1520_v6 }
 0x12e   : > { %v587_v4 = vmax.f32 %v574_v3, 0.0 }
 0x130   : > { %1275 = vmatmul.mubr.msk.f32.gmra.mrb[24].mxu1 %vm295_vm1, %v587_v4 }
 0x1d3   : > { %v708_v7 = vpop.f32.mrb[0].mxu1 }
 0x1d4   : > { %v709_v8 = vadd.f32 %v1098_v5, %v708_v7  ;;  %v1240_v9 = vpop.f32.mrb[1].mxu1 }
 0x1d6   : > { %773 = vst.msk [vmem:[%s1812_s16] sm:$0xff] %vm772_vm2, %v709_v8 }
 0x1d7   : > { %v713_v6 = vpop.f32.mrb[2].mxu1 }
 0x1d8   : > { %v714_v49 = vadd.f32 %v1098_v5, %v713_v6  ;;  %v1243_v10 = vpop.f32.mrb[3].mxu1 }
 0x1da   : > { %774 = vst.msk [vmem:[%s1812_s16 + $0x8] sm:$0xff] %vm772_vm2, %v714_v49 }
 0x1db   : > { %v718_v11 = vpop.f32.mrb[4].mxu1 }
 0x1dc   : > { %v719_v12 = vadd.f32 %v1098_v5, %v718_v11  ;;  %v1246_v13 = vpop.f32.mrb[5].mxu1 }
 0x1de   : > { %775 = vst.msk [vmem:[%s1812_s16 + $0x10] sm:$0xff] %vm772_vm2, %v719_v12 }
 0x1df   : > { %v723_v14 = vpop.f32.mrb[6].mxu1 }
 0x1e0   : > { %v724_v15 = vadd.f32 %v1098_v5, %v723_v14  ;;  %v1249_v16 = vpop.f32.mrb[7].mxu1 }
 0x1e2   : > { %776 = vst.msk [vmem:[%s1812_s16 + $0x18] sm:$0xff] %vm772_vm2, %v724_v15 }
 0x1e3   : > { %v728_v17 = vpop.f32.mrb[8].mxu1 }
 0x1e4   : > { %v729_v18 = vadd.f32 %v1098_v5, %v728_v17  ;;  %v1252_v19 = vpop.f32.mrb[9].mxu1 }
 0x1e6   : > { %777 = vst.msk [vmem:[%s1812_s16 + $0x20] sm:$0xff] %vm772_vm2, %v729_v18 }
 0x1e7   : > { %v733_v20 = vpop.f32.mrb[10].mxu1 }
 0x1e8   : > { %v734_v21 = vadd.f32 %v1098_v5, %v733_v20  ;;  %v1255_v22 = vpop.f32.mrb[11].mxu1 }
 0x1ea   : > { %778 = vst.msk [vmem:[%s1812_s16 + $0x28] sm:$0xff] %vm772_vm2, %v734_v21 }
 0x1eb   : > { %v738_v23 = vpop.f32.mrb[12].mxu1 }
 0x1ec   : > { %v739_v24 = vadd.f32 %v1098_v5, %v738_v23  ;;  %v1258_v25 = vpop.f32.mrb[13].mxu1 }
 0x1ee   : > { %779 = vst.msk [vmem:[%s1812_s16 + $0x30] sm:$0xff] %vm772_vm2, %v739_v24 }
 0x1ef   : > { %v743_v26 = vpop.f32.mrb[14].mxu1 }
 0x1f0   : > { %v744_v27 = vadd.f32 %v1098_v5, %v743_v26  ;;  %v1261_v28 = vpop.f32.mrb[15].mxu1 }
 0x1f2   : > { %780 = vst.msk [vmem:[%s1812_s16 + $0x38] sm:$0xff] %vm772_vm2, %v744_v27 }
 0x1f3   : > { %v748_v29 = vpop.f32.mrb[16].mxu1 }
 0x1f4   : > { %v749_v30 = vadd.f32 %v1098_v5, %v748_v29  ;;  %v1264_v31 = vpop.f32.mrb[17].mxu1 }
 0x1f6   : > { %781 = vst.msk [vmem:[%s1812_s16 + $0x40] sm:$0xff] %vm772_vm2, %v749_v30 }
 0x1f7   : > { %v753_v32 = vpop.f32.mrb[18].mxu1 }
 0x1f8   : > { %v754_v33 = vadd.f32 %v1098_v5, %v753_v32  ;;  %v1267_v34 = vpop.f32.mrb[19].mxu1 }
 0x1fa   : > { %782 = vst.msk [vmem:[%s1812_s16 + $0x48] sm:$0xff] %vm772_vm2, %v754_v33 }
 0x1fb   : > { %v758_v35 = vpop.f32.mrb[20].mxu1 }
 0x1fc   : > { %v759_v36 = vadd.f32 %v1098_v5, %v758_v35  ;;  %v1270_v37 = vpop.f32.mrb[21].mxu1 }
 0x1fe   : > { %783 = vst.msk [vmem:[%s1812_s16 + $0x50] sm:$0xff] %vm772_vm2, %v759_v36 }
 0x1ff   : > { %v763_v38 = vpop.f32.mrb[22].mxu1 }
 0x200   : > { %v764_v39 = vadd.f32 %v1098_v5, %v763_v38  ;;  %v1273_v40 = vpop.f32.mrb[23].mxu1  ;;  %792 = sbr.rel (!%p1583_p3) target bundleno = 580 (0x244), region = 52 }
 0x202   : > { %784 = vst.msk [vmem:[%s1812_s16 + $0x58] sm:$0xff] %vm772_vm2, %v764_v39 }
 0x203   : > { %v768_v41 = vpop.f32.mrb[24].mxu1 }
 0x204   : > { %v769_v42 = vadd.f32 %v1098_v5, %v768_v41  ;;  %v1276_v43 = vpop.f32.mrb[25].mxu1 }
 0x206   : > { %785 = vst.msk [vmem:[%s1812_s16 + $0x60] sm:$0xff] %vm772_vm2, %v769_v42 }
 0x207   : > { %s1951_s18 = smov (!%p795_p9, %s794_s18), 13 }
 0x208   : > { %s1112_s29 = sshll.u32 %s1951_s18, 7 }
 0x209   : > { %p1115_p10 = scmp.eq.s32.totalorder %s1112_s29, 0 }
 0x20a   : > { %1410 = sdivrem.u32 (!%p1115_p10), %s1951_s18, 13 }
 0x20b   : > { %803 = sbr.rel (%p1115_p10) target bundleno = 580 (0x244), region = 56 }
 0x213   : > { %s1853_s26 = spop.drf %1410 }
 0x214   : > { %p1116_p11 = scmp.le.s32.totalorder %s1853_s26, 0 }
 0x215   : > { %s1941_s20 = smov (!%p1116_p11), %s1847_s27  ;;  %s1942_s12 = smov (!%p1116_p11), %s1812_s16 }
 0x216   : > { %1016 = sbr.rel (%p1116_p11) target bundleno = 551 (0x227), region = 135  ;;  %s1862_s30 = smov (!%p1116_p11), 0  }
 0x217   : > { %s1864_s6 = smov (!%p1116_p11), 0  }
 0x21d LB: >> { %v891_v44 = vld [vmem:[%s1492_s12] sm:$0xff]  ;;  %v893_v45 = vld [vmem:[%s1492_s12 + $0x8] sm:$0xff]  ;;  %v895_v46 = vld [vmem:[%s1492_s12 + $0x10] sm:$0xff]  ;;  %s917_s7 = sadd.s32 1, %s1496_s30  ;;  %s885_s6 = sadd.s32 1, %s1500_s6   ;;  %s1500_s6 = sphi %s1864_s6, %s885_s6   ;;  %s1496_s30 = sphi %s1862_s30, %s1943_s30   ;;  %s1492_s12 = sphi %s1942_s12, %s922_s12   ;;  %s1488_s20 = sphi %s1941_s20, %s923_s20  }
 0x21e   : >> { %892 = vst [vmem:[%s1488_s20] sm:$0xff] %v891_v44  ;;  %894 = vst [vmem:[%s1488_s20 + $0x8] sm:$0xff] %v893_v45  ;;  %v897_v47 = vld [vmem:[%s1492_s12 + $0x18] sm:$0xff]  ;;  %v899_v48 = vld [vmem:[%s1492_s12 + $0x20] sm:$0xff]  ;;  %p918_p12 = scmp.ge.s32.totalorder %s917_s7, %s1853_s26  ;;  %p884_p13 = scmp.ge.s32.totalorder %s885_s6, %s1853_s26 }
 0x21f   : >> { %896 = vst [vmem:[%s1488_s20 + $0x10] sm:$0xff] %v895_v46  ;;  %v901_v50 = vld [vmem:[%s1492_s12 + $0x28] sm:$0xff]  ;;  %898 = vst [vmem:[%s1488_s20 + $0x18] sm:$0xff] %v897_v47  ;;  %v903_v51 = vld [vmem:[%s1492_s12 + $0x30] sm:$0xff] }
 0x220   : >> { %900 = vst [vmem:[%s1488_s20 + $0x20] sm:$0xff] %v899_v48  ;;  %902 = vst [vmem:[%s1488_s20 + $0x28] sm:$0xff] %v901_v50  ;;  %v905_v52 = vld [vmem:[%s1492_s12 + $0x38] sm:$0xff]  ;;  %v907_v53 = vld [vmem:[%s1492_s12 + $0x40] sm:$0xff]  ;;  %s1953_s7 = smov (%p918_p12, %s917_s7), 0  ;;  %887 = sbr.rel (!%p884_p13) target bundleno = 541 (0x21d), region = 141 }
 0x221   : >> { %904 = vst [vmem:[%s1488_s20 + $0x30] sm:$0xff] %v903_v51  ;;  %906 = vst [vmem:[%s1488_s20 + $0x38] sm:$0xff] %v905_v52  ;;  %v909_v54 = vld [vmem:[%s1492_s12 + $0x48] sm:$0xff]  ;;  %v911_v55 = vld [vmem:[%s1492_s12 + $0x50] sm:$0xff]  ;;  %s920_s8 = smul.u32 104, %s1953_s7  ;;  %s1943_s30 = smov %s1953_s7 }
 0x222   : >> { %908 = vst [vmem:[%s1488_s20 + $0x40] sm:$0xff] %v907_v53  ;;  %v913_v56 = vld [vmem:[%s1492_s12 + $0x58] sm:$0xff]  ;;  %910 = vst [vmem:[%s1488_s20 + $0x48] sm:$0xff] %v909_v54  ;;  %v915_v57 = vld [vmem:[%s1492_s12 + $0x60] sm:$0xff] }
 0x223   : >> { %912 = vst [vmem:[%s1488_s20 + $0x50] sm:$0xff] %v911_v55  ;;  %914 = vst [vmem:[%s1488_s20 + $0x58] sm:$0xff] %v913_v56  ;;  %s922_s12 = scalar_lea.vmem %s1812_s16, %s920_s8 [#allocation3]  }
 0x224   : >> { %916 = vst [vmem:[%s1488_s20 + $0x60] sm:$0xff] %v915_v57  ;;  %s923_s20 = scalar_lea.vmem %s1847_s27, %s920_s8  }
 0x227 PF: > { %1412 = sdivrem.u32 %s1951_s18, 13 }
 0x228   : > { %s1117_s9 = smul.u32 104, %s1853_s26 }
 0x22a   : > { %s928_s10 = scalar_lea.vmem %s1812_s16, %s1117_s9 [#allocation3]   ;;  %s930_s11 = scalar_lea.vmem %s1847_s27, %s1117_s9  }
 0x230   : > { %s1413_s13 = spop.drf %1412 }
 0x231   : > { %p1119_p0 = scmp.le.s32.totalorder %s1413_s13, 0 }
 0x232   : > { %s1502_s14 = smov (!%p1119_p0), %s930_s11   ;;  %s1506_s15 = smov (!%p1119_p0), %s928_s10  }
 0x233   : > { %1030 = sbr.rel (%p1119_p0) target bundleno = 580 (0x244), region = 146  ;;  %s1510_s17 = smov (!%p1119_p0), 0  }
 0x234   : > { %s1514_s23 = smov (!%p1119_p0), 0  }
 0x23a LB: >> { %v940_v58 = vld [vmem:[%s1508_s15] sm:$0xff]  ;;  %s942_s25 = sadd.s32 1, %s1512_s17  ;;  %s934_s23 = sadd.s32 1, %s1516_s23   ;;  %s1516_s23 = sphi %s1514_s23, %s934_s23   ;;  %s1512_s17 = sphi %s1510_s17, %s1511_s17   ;;  %s1508_s15 = sphi %s1506_s15, %s947_s15   ;;  %s1504_s14 = sphi %s1502_s14, %s948_s14  }
 0x23b   : >> { %941 = vst [vmem:[%s1504_s14] sm:$0xff] %v940_v58  ;;  %p943_p1 = scmp.ge.s32.totalorder %s942_s25, %s1413_s13  ;;  %p933_p2 = scmp.ge.s32.totalorder %s934_s23, %s1413_s13 }
 0x23d   : >> { %s1955_s25 = smov (%p943_p1, %s942_s25), 0  ;;  %936 = sbr.rel (!%p933_p2) target bundleno = 570 (0x23a), region = 152 }
 0x23e   : >> { %s1120_s16 = sshll.u32 %s1955_s25, 3  ;;  %s1511_s17 = smov %s1955_s25  }
 0x23f   : >> { %s947_s15 = scalar_lea.vmem %s928_s10, %s1120_s16 [#allocation3]   ;;  %s948_s14 = scalar_lea.vmem %s930_s11, %s1120_s16  }
 0x244 PF: > { %s15_s22 = sadd.s32 1, %s1484_s22   ;;  %s1944_s18 = smov %s1472_s19 }
 0x245   : > { %p12_p3 = scmp.ge.s32.totalorder %s15_s22, 4   ;;  %s1945_s19 = smov %s1592_s28 }
 0x246   : > { %s1946_s20 = smov %s1480_s21  ;;  %s1947_s21 = smov %s1949_s24 }
 0x247   :  { %14 = sbr.rel (!%p12_p3) target bundleno = 3 (0x3), region = 163 }

</bundles_post_ra>
